<compile_context>
chip_gen: v5e
topology: v5e:2x2
jax: 0.10.0
libtpu: 0.0.40
codegen_flags: <defaults>
</compile_context>

<pallas_src>
import functools

import numpy as np
import jax
import jax.numpy as jnp
from jax.experimental import pallas as pl
from jax.experimental.pallas import tpu as pltpu

LATENT = 32
NUM_HEADS = 3
NUM_CLASSES = 2
FEAT = NUM_HEADS * LATENT          # 96
PACK = 4                           # original rows packed per lane-dense row
FEAT_P = PACK * FEAT               # 384 lanes -> no 96->128 lane padding waste
HEADS_P = PACK * NUM_HEADS         # 12 fused logit-difference columns
OUT_P = PACK * NUM_CLASSES         # 8 packed output lanes


def _round_up(x, m):
    return (x + m - 1) // m * m


def _classifier_kernel(feat_ref, w_ref, b_ref, a0_ref, a1_ref, out_ref, *, apply_log):
    # feat_ref: [TB, 384]  4 packed batch rows x (3 heads x 32 latents) per sublane row
    # w_ref:    [384, 12]  block-diagonal per-(pack, head) logit-difference weights
    # b_ref:    [1, 12]    per-head logit-difference bias, tiled over the 4 packs
    # a0/a1:    [12, 8]    head-average (1/3) + class-interleave matrices
    # out_ref:  [TB, 8]    4 packed rows x [P(class0), P(class1)]
    #
    # NOTE on partial last tiles: rows past the true batch compute on whatever
    # padding the DMA brought in; that is fine because everything here is
    # strictly row-wise and Pallas discards the overhanging output writes.
    f = jnp.maximum(feat_ref[...].astype(jnp.float32), 0.0)      # relu, all heads/packs at once

    # One fused contraction: per-(pack, head) logit difference d = l0 - l1.
    d = jnp.dot(f, w_ref[...], preferred_element_type=jnp.float32) + b_ref[...]   # [TB, 12]

    # Numerically-stable 2-class softmax (identical to max-subtracted softmax):
    # e0, e1 are both in (0, 1] so nothing overflows, and P(class1) stays
    # accurate when heads saturate (no 1 - p0 cancellation -> no spurious -inf
    # on the log path).
    m = jnp.maximum(d, 0.0)
    e0 = jnp.exp(d - m)                                            # class-0 numerator
    e1 = jnp.exp(-m)                                               # class-1 numerator
    r = 1.0 / (e0 + e1)                                            # exact; only 12/384 lanes
    p0 = e0 * r
    p1 = e1 * r

    # Average the 3 heads of each packed row and interleave [P0, P1] per row
    # using two tiny MXU contractions (avoids strided-lane gathers/relayouts).
    a = (jnp.dot(p0, a0_ref[...], preferred_element_type=jnp.float32)
         + jnp.dot(p1, a1_ref[...], preferred_element_type=jnp.float32))          # [TB, 8]
    if apply_log:                                                  # training + log_softmax path
        a = jnp.log(a)
    out_ref[...] = a.astype(out_ref.dtype)


def classifier_noisy_label_forward(feature, params, *, idx_task=-1,
                                   training=False, log_softmax=True,
                                   tile_b=8192):
    """Equivalent of ClassifierNoisyLabel.forward.

    feature: [B, 96] (f32, or bf16 to halve the HBM read stream — the kernel
             promotes to f32 internally)
    params:  dict with 'wx','bx','wy','by','wz','bz' stacked over num_task+1
             tasks: w* -> [T, 32, 2] (pre-transposed Linear weights),
             b* -> [T, 1, 2]
    tile_b:  batch rows per grid step (default 8192 fits the default
             scoped-VMEM on v5e/v6e/v7x double-buffered; larger values may
             need pltpu.CompilerParams(vmem_limit_bytes=...)).
    """
    num_layers = params["wx"].shape[0]
    assert idx_task in [-1] + list(range(num_layers)), \
        f"idx_task {idx_task} must be -1 or in range({num_layers})"
    assert feature.shape[1] == FEAT

    # ---- tiny plain-JAX parameter fusion (task select + 2-class logit diff) ----
    def _diff(w, b):
        return w[:, 0] - w[:, 1], b[0, 0] - b[0, 1]

    wd, bd = zip(*[_diff(params[wk][idx_task], params[bk][idx_task])
                   for wk, bk in (("wx", "bx"), ("wy", "by"), ("wz", "bz"))])

    w_small = jnp.zeros((FEAT, NUM_HEADS), jnp.float32)            # [96, 3] per-head block-diag
    for h in range(NUM_HEADS):
        w_small = w_small.at[h * LATENT:(h + 1) * LATENT, h].set(wd[h].astype(jnp.float32))
    # 4-way block diagonal: one dense 384-lane contraction handles 4 packed rows.
    w_blk = jnp.kron(jnp.eye(PACK, dtype=jnp.float32), w_small)    # [384, 12]
    b_blk = jnp.tile(jnp.stack(bd).astype(jnp.float32).reshape(1, NUM_HEADS),
                     (1, PACK))                                    # [1, 12]

    # Head-averaging + class-interleave matrices (compile-time constants).
    a0_np = np.zeros((HEADS_P, OUT_P), np.float32)
    a1_np = np.zeros((HEADS_P, OUT_P), np.float32)
    for g in range(PACK):
        for h in range(NUM_HEADS):
            a0_np[NUM_HEADS * g + h, NUM_CLASSES * g] = 1.0 / NUM_HEADS
            a1_np[NUM_HEADS * g + h, NUM_CLASSES * g + 1] = 1.0 / NUM_HEADS
    a0 = jnp.asarray(a0_np)
    a1 = jnp.asarray(a1_np)

    apply_log = bool(training and log_softmax)

    # ---- lane-dense packing: [B, 96] -> [B/4, 384] (free row-major reshape) ----
    B = feature.shape[0]
    b_pad = _round_up(B, PACK)
    if b_pad != B:
        # Rare path (B % 4 != 0): one-off pad copy so the packed view exists.
        feature = jnp.pad(feature, ((0, b_pad - B), (0, 0)))
    n_rows = b_pad // PACK
    feat_p = feature.reshape(n_rows, FEAT_P)

    # ---- batch tiling: biggest sublane-aligned tile, but keep >=2 grid steps
    # when the batch is large enough so v7x's two TensorCores both get work
    # (harmless on single-TC v5e/v6e). ----
    tb = min(max(tile_b // PACK, 8), _round_up(n_rows, 8))
    half = _round_up(pl.cdiv(n_rows, 2), 8)
    if half >= 256:                          # never shrink below 1024 original rows just to split
        tb = min(tb, half)
    grid = (pl.cdiv(n_rows, tb),)

    kernel = functools.partial(_classifier_kernel, apply_log=apply_log)
    out_p = pl.pallas_call(
        kernel,
        out_shape=jax.ShapeDtypeStruct((n_rows, OUT_P), jnp.float32),
        grid=grid,
        in_specs=[
            pl.BlockSpec((tb, FEAT_P), lambda i: (i, 0)),        # streamed packed feature rows
            pl.BlockSpec((FEAT_P, HEADS_P), lambda i: (0, 0)),   # resident fused weights
            pl.BlockSpec((1, HEADS_P), lambda i: (0, 0)),        # resident fused bias
            pl.BlockSpec((HEADS_P, OUT_P), lambda i: (0, 0)),    # class-0 average/interleave
            pl.BlockSpec((HEADS_P, OUT_P), lambda i: (0, 0)),    # class-1 average/interleave
        ],
        out_specs=pl.BlockSpec((tb, OUT_P), lambda i: (i, 0)),
        compiler_params=pltpu.CompilerParams(
            dimension_semantics=("parallel",)),
    )(feat_p, w_blk, b_blk, a0, a1)

    out = out_p.reshape(b_pad, NUM_CLASSES)                       # free row-major reshape back
    return out[:B] if b_pad != B else out


def init_params(key, num_task):
    """Synthetic init matching nn.Linear(32, 2) shapes.

    Weights stored pre-transposed as [in=32, out=2]; biases as [1, 2].
    """
    T = num_task + 1
    ks = jax.random.split(key, 6)
    bound = 1.0 / jnp.sqrt(LATENT)           # PyTorch Linear default uniform bound

    def w(k):
        return jax.random.uniform(k, (T, LATENT, NUM_CLASSES), jnp.float32,
                                  minval=-bound, maxval=bound)

    def b(k):
        return jax.random.uniform(k, (T, 1, NUM_CLASSES), jnp.float32,
                                  minval=-bound, maxval=bound)

    return {"wx": w(ks[0]), "bx": b(ks[1]),
            "wy": w(ks[2]), "by": b(ks[3]),
            "wz": w(ks[4]), "bz": b(ks[5])}


def _reference(feature, params, idx_task, apply_log):
    """Pure-JAX reference mirroring the PyTorch module (full softmax form)."""
    wx, bx = params["wx"][idx_task], params["bx"][idx_task]
    wy, by = params["wy"][idx_task], params["by"][idx_task]
    wz, bz = params["wz"][idx_task], params["bz"][idx_task]
    x = jax.nn.relu(feature[:, :LATENT])
    y = jax.nn.relu(feature[:, LATENT:2 * LATENT])
    z = jax.nn.relu(feature[:, 2 * LATENT:])
    a = (jax.nn.softmax(x @ wx + bx, axis=1)
         + jax.nn.softmax(y @ wy + by, axis=1)
         + jax.nn.softmax(z @ wz + bz, axis=1)) / 3.0
    return jnp.log(a) if apply_log else a


if __name__ == "__main__":
    key = jax.random.PRNGKey(0)
    k_feat, k_param, k_feat2 = jax.random.split(key, 3)

    num_task = 3
    params = init_params(k_param, num_task)

    # --- small batch, f32, eval and training(log) branches, single tile ---
    B = 8
    feature = jax.random.normal(k_feat, (B, FEAT), jnp.float32)
    out_eval = classifier_noisy_label_forward(feature, params, idx_task=-1,
                                              training=False, log_softmax=True)
    out_train = classifier_noisy_label_forward(feature, params, idx_task=0,
                                               training=True, log_softmax=True)
    jax.block_until_ready((out_eval, out_train))
    ref_eval = _reference(feature, params, -1, apply_log=False)
    ref_train = _reference(feature, params, 0, apply_log=True)
    assert jnp.allclose(out_eval, ref_eval, atol=1e-5, rtol=1e-5)
    assert jnp.allclose(out_train, ref_train, atol=1e-5, rtol=1e-5)

    # --- bf16 feature, B not a multiple of 4 (pad path), multi-step grid ---
    B2 = 301
    feature2 = jax.random.normal(k_feat2, (B2, FEAT), jnp.float32)
    feature2_bf16 = feature2.astype(jnp.bfloat16)
    out2 = classifier_noisy_label_forward(feature2_bf16, params, idx_task=1,
                                          training=False, tile_b=128)
    jax.block_until_ready(out2)
    ref2 = _reference(feature2_bf16.astype(jnp.float32), params, 1, apply_log=False)
    assert out2.shape == (B2, NUM_CLASSES)
    assert jnp.allclose(out2, ref2, atol=1e-5, rtol=1e-5)

    # --- saturated heads: training/log path stays finite-accurate (no 1-p0 cancellation) ---
    feature3 = feature2 * 50.0
    out3 = classifier_noisy_label_forward(feature3, params, idx_task=2,
                                          training=True, tile_b=512)
    jax.block_until_ready(out3)
    ref3 = _reference(feature3, params, 2, apply_log=True)
    assert bool(jnp.all(jnp.isfinite(out3) == jnp.isfinite(ref3)))
    assert jnp.allclose(out3, ref3, atol=1e-4, rtol=1e-4)

    print("KERNEL_OK")
</pallas_src>

<mosaic_0001>
module attributes {stable_mosaic.version = 11 : i64} {
  func.func @_classifier_kernel(%arg0: i32, %arg1: memref<8x384xf32, #tpu.memory_space<vmem>>, %arg2: memref<384x12xf32, #tpu.memory_space<vmem>>, %arg3: memref<1x12xf32, #tpu.memory_space<vmem>>, %arg4: memref<12x8xf32, #tpu.memory_space<vmem>>, %arg5: memref<12x8xf32, #tpu.memory_space<vmem>>, %arg6: memref<8x8xf32, #tpu.memory_space<vmem>>) attributes {dimension_semantics = [#tpu.dimension_semantics<parallel>], iteration_bounds = array<i64: 1>, scalar_prefetch = 0 : i64, scratch_operands = 0 : i64, tpu.core_type = #tpu.core_type<tc>, window_params = [{transform_indices = @transform_0, window_bounds = array<i64: 8, 384>}, {pipeline_mode = #tpu.pipeline_mode<synchronous>, transform_indices = @transform_1, window_bounds = array<i64: 384, 12>}, {pipeline_mode = #tpu.pipeline_mode<synchronous>, transform_indices = @transform_2, window_bounds = array<i64: 1, 12>}, {pipeline_mode = #tpu.pipeline_mode<synchronous>, transform_indices = @transform_3, window_bounds = array<i64: 12, 8>}, {pipeline_mode = #tpu.pipeline_mode<synchronous>, transform_indices = @transform_4, window_bounds = array<i64: 12, 8>}, {transform_indices = @transform_5, window_bounds = array<i64: 8, 8>}]} {
    %c0 = arith.constant 0 : index
    %c0_0 = arith.constant 0 : index
    %0 = vector.load %arg1[%c0, %c0_0] : memref<8x384xf32, #tpu.memory_space<vmem>>, vector<8x384xf32>
    %cst = arith.constant 0.000000e+00 : f32
    %1 = vector.broadcast %cst : f32 to vector<8x384xf32>
    %2 = arith.maximumf %0, %1 : vector<8x384xf32>
    %c0_1 = arith.constant 0 : index
    %c0_2 = arith.constant 0 : index
    %3 = vector.load %arg2[%c0_1, %c0_2] : memref<384x12xf32, #tpu.memory_space<vmem>>, vector<384x12xf32>
    %cst_3 = arith.constant dense<0.000000e+00> : vector<8x12xf32>
    %4 = tpu.matmul %2, %3, %cst_3 {dimension_numbers = #tpu.dot_dimension_numbers<[1], [0], [0], [1], [0, 0, 1, 1], [], []>} : vector<8x384xf32>, vector<384x12xf32>, vector<8x12xf32> -> vector<8x12xf32>
    %c0_4 = arith.constant 0 : index
    %c0_5 = arith.constant 0 : index
    %5 = vector.load %arg3[%c0_4, %c0_5] : memref<1x12xf32, #tpu.memory_space<vmem>>, vector<1x12xf32>
    %6 = vector.broadcast %5 : vector<1x12xf32> to vector<8x12xf32>
    %7 = arith.addf %4, %6 : vector<8x12xf32>
    %cst_6 = arith.constant 0.000000e+00 : f32
    %8 = vector.broadcast %cst_6 : f32 to vector<8x12xf32>
    %9 = arith.maximumf %7, %8 : vector<8x12xf32>
    %10 = arith.subf %7, %9 : vector<8x12xf32>
    %11 = math.exp %10 : vector<8x12xf32>
    %cst_7 = arith.constant 0.000000e+00 : f32
    %12 = vector.broadcast %cst_7 : f32 to vector<8x12xf32>
    %13 = arith.subf %12, %9 : vector<8x12xf32>
    %14 = math.exp %13 : vector<8x12xf32>
    %15 = arith.addf %11, %14 : vector<8x12xf32>
    %cst_8 = arith.constant 1.000000e+00 : f32
    %16 = vector.broadcast %cst_8 : f32 to vector<8x12xf32>
    %17 = arith.divf %16, %15 : vector<8x12xf32>
    %18 = arith.mulf %11, %17 : vector<8x12xf32>
    %19 = arith.mulf %14, %17 : vector<8x12xf32>
    %c0_9 = arith.constant 0 : index
    %c0_10 = arith.constant 0 : index
    %20 = vector.load %arg4[%c0_9, %c0_10] : memref<12x8xf32, #tpu.memory_space<vmem>>, vector<12x8xf32>
    %cst_11 = arith.constant dense<0.000000e+00> : vector<8x8xf32>
    %21 = tpu.matmul %18, %20, %cst_11 {dimension_numbers = #tpu.dot_dimension_numbers<[1], [0], [0], [1], [0, 0, 1, 1], [], []>} : vector<8x12xf32>, vector<12x8xf32>, vector<8x8xf32> -> vector<8x8xf32>
    %c0_12 = arith.constant 0 : index
    %c0_13 = arith.constant 0 : index
    %22 = vector.load %arg5[%c0_12, %c0_13] : memref<12x8xf32, #tpu.memory_space<vmem>>, vector<12x8xf32>
    %cst_14 = arith.constant dense<0.000000e+00> : vector<8x8xf32>
    %23 = tpu.matmul %19, %22, %cst_14 {dimension_numbers = #tpu.dot_dimension_numbers<[1], [0], [0], [1], [0, 0, 1, 1], [], []>} : vector<8x12xf32>, vector<12x8xf32>, vector<8x8xf32> -> vector<8x8xf32>
    %24 = arith.addf %21, %23 : vector<8x8xf32>
    %c0_15 = arith.constant 0 : index
    %c0_16 = arith.constant 0 : index
    %25 = vector.load %arg6[%c0_15, %c0_16] : memref<8x8xf32, #tpu.memory_space<vmem>>, vector<8x8xf32>
    tpu.vector_store %arg6[%c0_15, %c0_16], %24 {strides = array<i32>} : memref<8x8xf32, #tpu.memory_space<vmem>>, vector<8x8xf32>,
    return
  }
  func.func @transform_0(%arg0: i32) -> (i32, i32) {
    %c0_i32 = arith.constant 0 : i32
    %c0_i32_0 = arith.constant 0 : i32
    return %arg0, %c0_i32 : i32, i32
  }
  func.func @transform_1(%arg0: i32) -> (i32, i32) {
    %c0_i32 = arith.constant 0 : i32
    %c0_i32_0 = arith.constant 0 : i32
    %c0_i32_1 = arith.constant 0 : i32
    return %c0_i32, %c0_i32_0 : i32, i32
  }
  func.func @transform_2(%arg0: i32) -> (i32, i32) {
    %c0_i32 = arith.constant 0 : i32
    %c0_i32_0 = arith.constant 0 : i32
    %c0_i32_1 = arith.constant 0 : i32
    return %c0_i32, %c0_i32_0 : i32, i32
  }
  func.func @transform_3(%arg0: i32) -> (i32, i32) {
    %c0_i32 = arith.constant 0 : i32
    %c0_i32_0 = arith.constant 0 : i32
    %c0_i32_1 = arith.constant 0 : i32
    return %c0_i32, %c0_i32_0 : i32, i32
  }
  func.func @transform_4(%arg0: i32) -> (i32, i32) {
    %c0_i32 = arith.constant 0 : i32
    %c0_i32_0 = arith.constant 0 : i32
    %c0_i32_1 = arith.constant 0 : i32
    return %c0_i32, %c0_i32_0 : i32, i32
  }
  func.func @transform_5(%arg0: i32) -> (i32, i32) {
    %c0_i32 = arith.constant 0 : i32
    %c0_i32_0 = arith.constant 0 : i32
    return %arg0, %c0_i32 : i32, i32
  }
}

</mosaic_0001>

<bundles_post_ra>
// kernel: tpu_custom_call.1
= control target key start
LH: loop header
LB: loop body
LE: loop exit
PB: predicated region body
PF: predicated region fallthrough
CT: control target
= control target key end

     0   :  { %s510_s0 = inlined_call_operand.vmem [shape: f32[2,384], index: 0, kind: input, shape index: {}]   ;;  %s511_s1 = inlined_call_operand.vmem [shape: f32[384,12], index: 1, kind: input, shape index: {}]   ;;  %s512_s2 = inlined_call_operand.vmem [shape: f32[1,12], index: 2, kind: input, shape index: {}]   ;;  %s513_s3 = inlined_call_operand.vmem [shape: f32[12,8], index: 3, kind: input, shape index: {}]   ;;  %s514_s4 = inlined_call_operand.vmem [shape: f32[12,8], index: 4, kind: input, shape index: {}]   ;;  %s515_s5 = inlined_call_operand.hbm [shape: f32[2,8], index: 5, kind: output, shape index: {}]  }
   0x1   :  { %v76_v0 = vld [vmem:[%s511_s1 + $0x178] sm:$0xff] }
   0x2   :  { %10 = vsyncpa [#allocation3], 0  ;;  %v44_v1 = vld [vmem:[%s511_s1 + $0x78] sm:$0xff]  ;;  %138 = vmatpush.msra.mxu2 %v76_v0  ;;  %v75_v2 = vld [vmem:[%s511_s1 + $0x170] sm:$0xff]  ;;  %vm191_vm0 = vcmask 1043456   ;;  %vm187_vm5 = vcmask 97280  }
   0x3   :  { %98 = vmatpush.msra.mxu0 %v44_v1  ;;  %v43_v3 = vld [vmem:[%s511_s1 + $0x70] sm:$0xff]  ;;  %v60_v4 = vld [vmem:[%s511_s1 + $0xf8] sm:$0xff]  ;;  %v74_v5 = vld [vmem:[%s511_s1 + $0x168] sm:$0xff]  ;;  %vm241_vm6 = vcmask 64512  }
   0x4   :  { %118 = vmatpush.msra.mxu1 %v60_v4  ;;  %v42_v6 = vld [vmem:[%s511_s1 + $0x68] sm:$0xff]  ;;  %v59_v7 = vld [vmem:[%s511_s1 + $0xf0] sm:$0xff]  ;;  %139 = vmatpush.msra.mxu2 %v75_v2  ;;  %v73_v9 = vld [vmem:[%s511_s1 + $0x160] sm:$0xff] }
   0x5   :  { %99 = vmatpush.msra.mxu0 %v43_v3  ;;  %v58_v8 = vld [vmem:[%s511_s1 + $0xe8] sm:$0xff]  ;;  %v41_v10 = vld [vmem:[%s511_s1 + $0x60] sm:$0xff]  ;;  %v72_v12 = vld [vmem:[%s511_s1 + $0x158] sm:$0xff] }
   0x6   :  { %119 = vmatpush.msra.mxu1 %v59_v7  ;;  %140 = vmatpush.msra.mxu2 %v74_v5  ;;  %v57_v11 = vld [vmem:[%s511_s1 + $0xe0] sm:$0xff]  ;;  %v40_v13 = vld [vmem:[%s511_s1 + $0x58] sm:$0xff]  ;;  %v71_v15 = vld [vmem:[%s511_s1 + $0x150] sm:$0xff] }
   0x7   :  { %100 = vmatpush.msra.mxu0 %v42_v6  ;;  %v56_v14 = vld [vmem:[%s511_s1 + $0xd8] sm:$0xff]  ;;  %v39_v16 = vld [vmem:[%s511_s1 + $0x50] sm:$0xff]  ;;  %v70_v18 = vld [vmem:[%s511_s1 + $0x148] sm:$0xff] }
   0x8   :  { %120 = vmatpush.msra.mxu1 %v58_v8  ;;  %141 = vmatpush.msra.mxu2 %v73_v9  ;;  %v55_v17 = vld [vmem:[%s511_s1 + $0xd0] sm:$0xff]  ;;  %v38_v19 = vld [vmem:[%s511_s1 + $0x48] sm:$0xff]  ;;  %v69_v21 = vld [vmem:[%s511_s1 + $0x140] sm:$0xff] }
   0x9   :  { %101 = vmatpush.msra.mxu0 %v41_v10  ;;  %v54_v20 = vld [vmem:[%s511_s1 + $0xc8] sm:$0xff]  ;;  %v37_v22 = vld [vmem:[%s511_s1 + $0x40] sm:$0xff]  ;;  %v68_v23 = vld [vmem:[%s511_s1 + $0x138] sm:$0xff] }
   0xa   :  { %121 = vmatpush.msra.mxu1 %v57_v11  ;;  %142 = vmatpush.msra.mxu2 %v72_v12  ;;  %v53_v24 = vld [vmem:[%s511_s1 + $0xc0] sm:$0xff]  ;;  %v36_v25 = vld [vmem:[%s511_s1 + $0x38] sm:$0xff]  ;;  %v67_v26 = vld [vmem:[%s511_s1 + $0x130] sm:$0xff] }
   0xb   :  { %102 = vmatpush.msra.mxu0 %v40_v13  ;;  %v35_v27 = vld [vmem:[%s511_s1 + $0x30] sm:$0xff]  ;;  %v52_v28 = vld [vmem:[%s511_s1 + $0xb8] sm:$0xff]  ;;  %v21_v29 = vld [vmem:[%s510_s0] sm:$0x3f] }
   0xc   :  { %122 = vmatpush.msra.mxu1 %v56_v14  ;;  %143 = vmatpush.msra.mxu2 %v71_v15  ;;  %v22_v30 = vld [vmem:[%s510_s0 + $0x6] sm:$0x3f]  ;;  %v23_v31 = vld [vmem:[%s510_s0 + $0xc] sm:$0x3f]  ;;  %v24_v32 = vld [vmem:[%s510_s0 + $0x12] sm:$0x3f] }
   0xd   :  { %103 = vmatpush.msra.mxu0 %v39_v16  ;;  %v25_v33 = vmax.f32 %v21_v29, 0.0  ;;  %v26_v34 = vmax.f32 %v22_v30, 0.0  ;;  %v51_v35 = vld [vmem:[%s511_s1 + $0xb0] sm:$0xff]  ;;  %v27_v36 = vmax.f32 %v23_v31, 0.0  ;;  %v28_v37 = vmax.f32 %v24_v32, 0.0  ;;  %v66_v38 = vld [vmem:[%s511_s1 + $0x128] sm:$0xff] }
   0xe   :  { %123 = vmatpush.msra.mxu1 %v55_v17  ;;  %144 = vmatpush.msra.mxu2 %v70_v18  ;;  %v34_v39 = vld [vmem:[%s511_s1 + $0x28] sm:$0xff]  ;;  %v65_v41 = vld [vmem:[%s511_s1 + $0x120] sm:$0xff]  ;;  %v64_v44 = vld [vmem:[%s511_s1 + $0x118] sm:$0xff] }
   0xf   :  { %104 = vmatpush.msra.mxu0 %v38_v19  ;;  %85 = vst [vmem:[#allocation1] ss:$4 sm:$0xff] %v25_v33  ;;  %v50_v40 = vld [vmem:[%s511_s1 + $0xa8] sm:$0xff]  ;;  %v33_v42 = vld [vmem:[%s511_s1 + $0x20] sm:$0xff]  ;;  %v32_v45 = vld [vmem:[%s511_s1 + $0x18] sm:$0xff] }
  0x10   :  { %124 = vmatpush.msra.mxu1 %v54_v20  ;;  %145 = vmatpush.msra.mxu2 %v69_v21  ;;  %87 = vst [vmem:[#allocation1 + $0x1] ss:$4 sm:$0xff] %v26_v34  ;;  %v49_v43 = vld [vmem:[%s511_s1 + $0xa0] sm:$0xff]  ;;  %v48_v46 = vld [vmem:[%s511_s1 + $0x98] sm:$0xff]  ;;  %v63_v47 = vld [vmem:[%s511_s1 + $0x110] sm:$0xff] }
  0x11   :  { %105 = vmatpush.msra.mxu0 %v37_v22  ;;  %89 = vst [vmem:[#allocation1 + $0x2] ss:$4 sm:$0xff] %v27_v36  ;;  %v31_v48 = vld [vmem:[%s511_s1 + $0x10] sm:$0xff]  ;;  %v62_v50 = vld [vmem:[%s511_s1 + $0x108] sm:$0xff]  ;;  %v61_v53 = vld [vmem:[%s511_s1 + $0x100] sm:$0xff] }
  0x12   :  { %125 = vmatpush.msra.mxu1 %v53_v24  ;;  %146 = vmatpush.msra.mxu2 %v68_v23  ;;  %91 = vst [vmem:[#allocation1 + $0x3] ss:$4 sm:$0xff] %v28_v37  ;;  %v47_v49 = vld [vmem:[%s511_s1 + $0x90] sm:$0xff]  ;;  %v30_v51 = vld [vmem:[%s511_s1 + $0x8] sm:$0xff]  ;;  %v29_v54 = vld [vmem:[%s511_s1] sm:$0xff] }
  0x13   :  { %106 = vmatpush.msra.mxu0 %v36_v25  ;;  %v46_v52 = vld [vmem:[%s511_s1 + $0x88] sm:$0xff]  ;;  %v45_v57 = vld [vmem:[%s511_s1 + $0x80] sm:$0xff] }
  0x14   :  { %126 = vmatpush.msra.mxu1 %v52_v28  ;;  %147 = vmatpush.msra.mxu2 %v67_v26  ;;  %v186_v59 = vld [vmem:[%s514_s4 + $0x8] sm:$0xf]  ;;  %v185_v60 = vld [vmem:[%s514_s4] sm:$0xff] }
  0x15   :  { %107 = vmatpush.msra.mxu0 %v35_v27  ;;  %261 = vmatpush.msk.msra.mxu3 %vm191_vm0, %v186_v59  ;;  %v268_v61 = vld [vmem:[%s512_s2] ss:$0 sm:$0xff]  ;;  %v184_v7 = vld [vmem:[%s513_s3 + $0x8] sm:$0xf] }
  0x16   :  { %127 = vmatpush.msra.mxu1 %v51_v35  ;;  %148 = vmatpush.msra.mxu2 %v66_v38  ;;  %v183_v8 = vld [vmem:[%s513_s3] sm:$0xff] }
  0x17   :  { %108 = vmatpush.msra.mxu0 %v34_v39  ;;  %210 = vmatpush.msra.mxu3 %v185_v60 }
  0x18   :  { %128 = vmatpush.msra.mxu1 %v50_v40  ;;  %149 = vmatpush.msra.mxu2 %v65_v41 }
  0x19   :  { %109 = vmatpush.msra.mxu0 %v33_v42  ;;  %v94_v55 = vld.sshfl [vmem:[#allocation1 + $0x10] sm:$0xff pattern:$0x73625140]  ;;  %v92_v56 = vld.sshfl [vmem:[#allocation1] sm:$0xff pattern:$0x73625140]  ;;  %263 = vmatpush.msk.msrb.mxu3 %vm191_vm0, %v184_v7 }
  0x1a   :  { %129 = vmatpush.msra.mxu1 %v49_v43  ;;  %150 = vmatpush.msra.mxu2 %v64_v44  ;;  %v93_v58 = vld.sshfl [vmem:[#allocation1 + $0x8] sm:$0xff pattern:$0x73625140] }
  0x1b   :  { %110 = vmatpush.msra.mxu0 %v32_v45  ;;  %236 = vmatpush.msrb.mxu3 %v183_v8 }
  0x1c   :  { %130 = vmatpush.msra.mxu1 %v48_v46  ;;  %151 = vmatpush.msra.mxu2 %v63_v47 }
  0x1d   :  { %111 = vmatpush.msra.mxu0 %v31_v48 }
  0x1e   :  { %131 = vmatpush.msra.mxu1 %v47_v49  ;;  %152 = vmatpush.msra.mxu2 %v62_v50 }
  0x1f   :  { %112 = vmatpush.msra.mxu0 %v30_v51 }
  0x20   :  { %132 = vmatpush.msra.mxu1 %v46_v52  ;;  %153 = vmatpush.msra.mxu2 %v61_v53 }
  0x21   :  { %113 = vmatpush.msra.mxu0 %v29_v54  ;;  %154 = vmatmul.f32.vlgmr.msra.gmra.mxu2 %v94_v55 }
  0x22   :  { %114 = vmatmul.f32.vlgmr.msra.gmra.mxu0 %v92_v56  ;;  %133 = vmatpush.msra.mxu1 %v45_v57 }
  0x23   :  { %134 = vmatmul.f32.vlgmr.msra.gmra.mxu1 %v93_v58 }
  0x9f   :  { %v115_v62 = vpop.f32.mrf.mxu0 }
  0xa0   :  { %v116_v63 = vadd.f32 %v268_v61, %v115_v62  ;;  %v135_v0 = vpop.f32.mrf.mxu1 }
  0xa2   :  { %v136_v1 = vadd.f32 %v135_v0, %v116_v63 }
  0xa4   :  { %v155_v2 = vpop.f32.mrf.mxu2 }
  0xa5   :  { %v156_v3 = vadd.f32 %v155_v2, %v136_v1 }
  0xa7   :  { %v158_v4 = vmax.f32 %v156_v3, 0.0 }
  0xa9   :  { %v159_v5 = vsub.f32 %v156_v3, %v158_v4  ;;  %v162_v6 = vsub.f32 0.0, %v158_v4 }
  0xab   :  { %v160_v9 = vmul.f32 1.442695, %v159_v5  ;;  %v163_v10 = vmul.f32 1.442695, %v162_v6 }
  0xad   :  { %269 = vpow2.f32 %v160_v9 }
  0xae   :  { %271 = vpow2.f32 %v163_v10 }
  0xb3   :  { %v270_v11 = vpop.eup %269 }
  0xb4   :  { %v272_v12 = vpop.eup %271 }
  0xb5   :  { %v165_v13 = vadd.f32 %v272_v12, %v270_v11 }
  0xb7   :  { %273 = vrcp.f32 %v165_v13  ;;  %v177_v17 = vand.u32 2147483648, %v165_v13  ;;  %v175_v19 = vand.u32 2147483647, %v165_v13  ;;  %vm171_vm2 = vweird.f32 %v165_v13 }
  0xb9   :  { %v178_v21 = vor.u32 1.1754944e-38, %v177_v17  ;;  %vm176_vm4 = vcmp.eq.f32.partialorder %v175_v19, 8.507059e+37 }
  0xbd   :  { %v274_v14 = vpop.eup %273 }
  0xbe   :  { %v167_v15 = vmul.f32 %v274_v14, %v165_v13  ;;  %vm172_vm1 = vweird.f32 %v274_v14 }
  0xbf   :  { %vm173_vm3 = vmor %vm171_vm2, %vm172_vm1 }
  0xc0   :  { %v168_v16 = vsub.f32 1.0, %v167_v15 }
  0xc2   :  { %v169_v18 = vmul.f32 %v274_v14, %v168_v16 }
  0xc4   :  { %v170_v20 = vadd.f32 %v274_v14, %v169_v18 }
  0xc6   :  { %v174_v22 = vsel %vm173_vm3, %v274_v14, %v170_v20 }
  0xc7   :  { %v179_v23 = vsel %vm176_vm4, %v178_v21, %v174_v22 }
  0xc8   :  { %v182_v24 = vmul.f32 %v272_v12, %v179_v23  ;;  %v181_v25 = vmul.f32 %v270_v11, %v179_v23 }
  0xca   :  { %262 = vmatmul.msk.f32.vlgmr.msra.gmra.mxu3 %vm187_vm5, %v182_v24 }
  0xd2   :  { %264 = vmatmul.msk.f32.vlgmr.msrb.gmra.mxu3 %vm187_vm5, %v181_v25 }
 0x14d   :  { %v212_v26 = vpop.f32.mrf.mxu3 }
 0x155   :  { %v238_v27 = vpop.f32.mrf.mxu3 }
 0x156   :  { %v239_v28 = vadd.f32 %v238_v27, %v212_v26 }
 0x158   :  { %242 = vst.msk [vmem:[#allocation2] sm:$0xff] %vm241_vm6, %v239_v28 }
 0x159   :  { %246 = vsyncadd [#allocation3], 96  ;;  %s249_s28 = sshll.u32 %s515_s5, 4  ;;  %s301_s29 = smov [#allocation2]   ;;  %s250_s28 = int_to_ptr.hbm [resolvable:$true] %s249_s28 }
 0x15a   :  { %s247_s30 = sshll.u32 %s301_s29, 4  ;;  %s302_s6 = smov 32   ;;  %s248_s30 = int_to_ptr.vmem [resolvable:$true] %s247_s30 }
 0x15b   :  { %s303_s7 = smov 2  }
 0x15c   :  { %255 = dma.vmem_to_hbm [thread:$0]  %s248_s30, 32, %s250_s28, [#allocation3], %s302_s6, %s302_s6, %s303_s7  }
 0x15d   :  { %299 = dma.done.wait [#allocation3], 128  }
 0x15e   :  { %300 = vsyncadd [#allocation3], 4294967168 }
 0x15f   :  { %260 = vsyncpa [#allocation3], 1 }

</bundles_post_ra>
